<compile_context>
chip_gen: v7x
topology: tpu7x:2x2x1
jax: 0.10.0
libtpu: 0.0.40
codegen_flags: <defaults>
</compile_context>

<pallas_src>
import functools

import jax
import jax.numpy as jnp
from jax import lax
from jax.experimental import pallas as pl
from jax.experimental.pallas import tpu as pltpu

LANES = 128
VMEM_BUDGET_BYTES = 32 * 1024 * 1024   # working-set target (buffers + temps)


def _all_loss_kernel(x_ref, t_ref, out_ref, acc,
                     *, s_rows, tile_s, steps, need_mask, binary_targets):
    """Accumulate per-batch-row, lane-parallel partial sums.

    acc rows: 0 = sum(x*t), 1 = sum(x), 2 = sum(t),
              3 = sum(g),   4 = sum(t*g)   with bce = -g.
    """
    c = pl.program_id(0)     # core slice (parallel axis)
    k = pl.program_id(1)     # sublane-tile step within this core (arbitrary)

    @pl.when(k == 0)
    def _():
        acc[...] = jnp.zeros_like(acc)

    x = x_ref[...].astype(jnp.float32)   # (N, tile_s, 128) probabilities
    t = t_ref[...].astype(jnp.float32)   # (N, tile_s, 128) targets

    if need_mask:
        # Ragged tail of the last tile: Pallas pads partial blocks with
        # unspecified values, so select-before-math.  Sublane-index compare
        # only (the lane-level tail is already zero-padded by the wrapper).
        s_idx = lax.broadcasted_iota(jnp.int32, (1, tile_s, LANES), 1)
        blk = c * steps + k
        valid = blk * tile_s + s_idx < s_rows
        x = jnp.where(valid, x, 0.0)
        t = jnp.where(valid, t, 0.0)

    # ---- Dice partial sums (per batch row, lane-parallel) ----
    acc[0] += jnp.sum(x * t, axis=1)
    acc[1] += jnp.sum(x, axis=1)
    acc[2] += jnp.sum(t, axis=1)

    # ---- Weighted BCE partial sums (sign applied once in the epilogue) ----
    if binary_targets:
        # Hard 0/1 targets: a single transcendental per element.
        g = jnp.maximum(jnp.log(jnp.where(t > 0.5, x, 1.0 - x)), -100.0)
    else:
        # Soft targets: full two-log form, re-associated to drop (1-t).
        log_x = jnp.maximum(jnp.log(x), -100.0)
        log_1mx = jnp.maximum(jnp.log(1.0 - x), -100.0)
        g = log_1mx + t * (log_x - log_1mx)
    acc[3] += jnp.sum(g, axis=1)
    acc[4] += jnp.sum(t * g, axis=1)
    # TODO(synk): on v7x (VALU-bound) try offloading these sublane reductions
    # to the idle MXU via a ones-vector dot_general; verify with a bundle dump.

    @pl.when(k == steps - 1)
    def _():
        out_ref[0] = acc[...]


def _largest_divisor_tile(s, cap):
    """Largest multiple of 8 <= cap that divides s, or None."""
    if s % 8 != 0:
        return None
    t = min(cap, s)
    t -= t % 8
    while t >= 8:
        if s % t == 0:
            return t
        t -= 8
    return None


def _choose_tiling(s_rows, tile_cap):
    """Returns (ncores, tile_s, steps_per_core, need_mask)."""
    # Prefer a 2-way core split (wins on v7x's 2 TCs, harmless when the two
    # slices are serialized on 1-TC chips) with an exact-divisor tile so the
    # in-kernel mask disappears entirely.
    if s_rows % 2 == 0 and s_rows >= 16:
        t = _largest_divisor_tile(s_rows // 2, tile_cap)
        if t is not None:
            return 2, t, (s_rows // 2) // t, False
    if s_rows <= tile_cap:
        return 1, s_rows, 1, False            # one full-extent block
    t = _largest_divisor_tile(s_rows, tile_cap)
    if t is not None:
        return 1, t, s_rows // t, False
    # Masked fallback (odd / non-multiple-of-8 row counts).
    tile_s = tile_cap
    total = -(-s_rows // tile_s)
    if total % 2 == 0 and total >= 4:
        return 2, tile_s, total // 2, True
    return 1, tile_s, total, True


@functools.partial(jax.jit, static_argnames=("assume_binary_targets",))
def all_loss(input_nchw, target_nhw, assume_binary_targets=False):
    """input: (N, 1, H, W) probabilities, target: (N, H, W) mask."""
    N = input_nchw.shape[0]
    # No dtype upcast here: HBM streams stay at the caller's width (bf16 x /
    # narrow targets are fine; the kernel casts on the VPU).
    x = input_nchw.reshape(N, -1)
    t = target_nhw.reshape(N, -1)
    F = x.shape[1]
    n_elems = N * F          # target.numel(); also dice flatten size (C == 1)

    # Pack features onto (sublane, lane): (N, F) -> (N, S, 128).  Free bitcast
    # when F % 128 == 0 (the common case for image-sized H*W).
    F_pad = pl.cdiv(F, LANES) * LANES
    if F_pad != F:
        # TODO(synk): lane-unaligned H*W still pays one zero-pad HBM pass;
        # fold the tiny ragged lane tail into the JAX epilogue to avoid it.
        x = jnp.pad(x, ((0, 0), (0, F_pad - F)))
        t = jnp.pad(t, ((0, 0), (0, F_pad - F)))
    S = F_pad // LANES
    x3 = x.reshape(N, S, LANES)
    t3 = t.reshape(N, S, LANES)

    # Tile sizing by actual itemsize, budgeting for double-buffered inputs
    # plus ~6 tile-sized f32 temporaries the elementwise chain may materialize.
    per_row = N * LANES * (2 * x3.dtype.itemsize + 2 * t3.dtype.itemsize + 6 * 4)
    tile_cap = max(8, (VMEM_BUDGET_BYTES // per_row) // 8 * 8)
    ncores, tile_s, steps, need_mask = _choose_tiling(S, tile_cap)

    kernel = functools.partial(
        _all_loss_kernel, s_rows=S, tile_s=tile_s, steps=steps,
        need_mask=need_mask, binary_targets=assume_binary_targets)

    in_idx = lambda c, k: (0, c * steps + k, 0)
    parts = pl.pallas_call(
        kernel,
        out_shape=jax.ShapeDtypeStruct((ncores, 5, N, LANES), jnp.float32),
        grid_spec=pltpu.PrefetchScalarGridSpec(
            num_scalar_prefetch=0,
            grid=(ncores, steps),
            in_specs=[pl.BlockSpec((N, tile_s, LANES), in_idx),
                      pl.BlockSpec((N, tile_s, LANES), in_idx)],
            out_specs=pl.BlockSpec((1, 5, N, LANES), lambda c, k: (c, 0, 0, 0)),
            scratch_shapes=[pltpu.VMEM((5, N, LANES), jnp.float32)],
        ),
        compiler_params=pltpu.CompilerParams(
            dimension_semantics=("parallel", "arbitrary"),
            vmem_limit_bytes=48 * 1024 * 1024),
    )(x3, t3)

    # ---- Tiny epilogue in plain JAX (combines per-core / per-lane partials) --
    p = jnp.sum(parts, axis=(0, 3))                      # (5, N)
    inter, sx, st, sg, stg = p[0], p[1], p[2], p[3], p[4]
    dice = 2.0 * (inter + 1.0) / (sx + st + 1.0)
    loss1 = 1.0 - jnp.sum(dice) / N

    total_t = jnp.sum(st)
    beta = 1.0 - total_t / n_elems
    sum_bce = -jnp.sum(sg)
    sum_tbce = -jnp.sum(stg)
    loss2 = ((1.0 - beta) * sum_bce + (2.0 * beta - 1.0) * sum_tbce) / n_elems
    return loss1 + 10.0 * loss2


def _reference(input_nchw, target_nhw):
    """Pure-JAX transcription of the PyTorch AllLoss forward, for checking."""
    N = target_nhw.shape[0]
    x_flat = input_nchw.reshape(N, -1).astype(jnp.float32)
    t_flat = target_nhw.reshape(N, -1).astype(jnp.float32)
    inter = jnp.sum(x_flat * t_flat, axis=1)
    dice = 2.0 * (inter + 1.0) / (jnp.sum(x_flat, 1) + jnp.sum(t_flat, 1) + 1.0)
    loss1 = 1.0 - jnp.sum(dice) / N

    t = target_nhw.astype(jnp.float32)
    beta = 1.0 - jnp.mean(t)
    xx = input_nchw[:, 0, :, :].astype(jnp.float32)
    w = 1.0 - beta + (2.0 * beta - 1.0) * t
    bce = -(t * jnp.maximum(jnp.log(xx), -100.0)
            + (1.0 - t) * jnp.maximum(jnp.log(1.0 - xx), -100.0))
    loss2 = jnp.mean(w * bce)
    return loss1 + 10.0 * loss2


if __name__ == "__main__":
    key = jax.random.PRNGKey(0)
    k1, k2 = jax.random.split(key)
    N, C, H, W = 2, 1, 16, 16
    # probabilities in (0, 1) as F.binary_cross_entropy expects
    inp = jax.nn.sigmoid(jax.random.normal(k1, (N, C, H, W), dtype=jnp.float32))
    tgt = (jax.random.uniform(k2, (N, H, W)) > 0.5).astype(jnp.float32)

    ref = _reference(inp, tgt)

    out = all_loss(inp, tgt)
    jax.block_until_ready(out)
    assert jnp.allclose(out, ref, rtol=1e-5, atol=1e-5), (out, ref)

    # Binary-target fast path (single transcendental per element) — exact for
    # hard 0/1 masks.
    out_bin = all_loss(inp, tgt, assume_binary_targets=True)
    jax.block_until_ready(out_bin)
    assert jnp.allclose(out_bin, ref, rtol=1e-5, atol=1e-5), (out_bin, ref)

    print("KERNEL_OK")
</pallas_src>

<mosaic_0001>
module attributes {stable_mosaic.version = 11 : i64} {
  func.func @_all_loss_kernel(%arg0: i32, %arg1: i32, %arg2: memref<2x2x128xf32, #tpu.memory_space<vmem>>, %arg3: memref<2x2x128xf32, #tpu.memory_space<vmem>>, %arg4: memref<1x5x2x128xf32, #tpu.memory_space<vmem>>, %arg5: memref<5x2x128xf32, #tpu.memory_space<vmem>>) attributes {dimension_semantics = [#tpu.dimension_semantics<parallel>, #tpu.dimension_semantics<arbitrary>], iteration_bounds = array<i64: 1, 1>, scalar_prefetch = 0 : i64, scratch_operands = 1 : i64, tpu.core_type = #tpu.core_type<tc>, window_params = [{transform_indices = @transform_0, window_bounds = array<i64: 2, 2, 128>}, {transform_indices = @transform_1, window_bounds = array<i64: 2, 2, 128>}, {transform_indices = @transform_2, window_bounds = array<i64: 1, 5, 2, 128>}]} {
    %c0_i32 = arith.constant 0 : i32
    %0 = arith.cmpi eq, %arg1, %c0_i32 : i32
    %1 = arith.extui %0 : i1 to i32
    %c0_i32_0 = arith.constant 0 : i32
    %2 = arith.cmpi ne, %1, %c0_i32_0 : i32
    scf.if %2 {
      %cst_41 = arith.constant 0.000000e+00 : f32
      %56 = vector.broadcast %cst_41 : f32 to vector<5x2x128xf32>
      %c0_42 = arith.constant 0 : index
      %c0_43 = arith.constant 0 : index
      %c0_44 = arith.constant 0 : index
      %57 = vector.load %arg5[%c0_42, %c0_43, %c0_44] : memref<5x2x128xf32, #tpu.memory_space<vmem>>, vector<5x2x128xf32>
      tpu.vector_store %arg5[%c0_42, %c0_43, %c0_44], %56 {strides = array<i32>} : memref<5x2x128xf32, #tpu.memory_space<vmem>>, vector<5x2x128xf32>,
    } else {
    }
    %c0 = arith.constant 0 : index
    %c0_1 = arith.constant 0 : index
    %c0_2 = arith.constant 0 : index
    %3 = vector.load %arg2[%c0, %c0_1, %c0_2] : memref<2x2x128xf32, #tpu.memory_space<vmem>>, vector<2x2x128xf32>
    %c0_3 = arith.constant 0 : index
    %c0_4 = arith.constant 0 : index
    %c0_5 = arith.constant 0 : index
    %4 = vector.load %arg3[%c0_3, %c0_4, %c0_5] : memref<2x2x128xf32, #tpu.memory_space<vmem>>, vector<2x2x128xf32>
    %c0_6 = arith.constant 0 : index
    %c0_7 = arith.constant 0 : index
    %c0_8 = arith.constant 0 : index
    %5 = vector.load %arg5[%c0_6, %c0_7, %c0_8] : memref<5x2x128xf32, #tpu.memory_space<vmem>>, vector<1x2x128xf32>
    %6 = vector.shape_cast %5 : vector<1x2x128xf32> to vector<2x128xf32>
    %7 = arith.mulf %3, %4 : vector<2x2x128xf32>
    %cst = arith.constant dense<0.000000e+00> : vector<2x128xf32>
    %8 = vector.multi_reduction <add>, %7, %cst [1] : vector<2x2x128xf32> to vector<2x128xf32>
    %9 = arith.addf %6, %8 : vector<2x128xf32>
    %c0_9 = arith.constant 0 : index
    %c0_10 = arith.constant 0 : index
    %c0_11 = arith.constant 0 : index
    %10 = vector.load %arg5[%c0_9, %c0_10, %c0_11] : memref<5x2x128xf32, #tpu.memory_space<vmem>>, vector<1x2x128xf32>
    %11 = vector.shape_cast %10 : vector<1x2x128xf32> to vector<2x128xf32>
    %12 = vector.shape_cast %9 : vector<2x128xf32> to vector<1x2x128xf32>
    tpu.vector_store %arg5[%c0_9, %c0_10, %c0_11], %12 {strides = array<i32>} : memref<5x2x128xf32, #tpu.memory_space<vmem>>, vector<1x2x128xf32>,
    %c1 = arith.constant 1 : index
    %c0_12 = arith.constant 0 : index
    %c0_13 = arith.constant 0 : index
    %13 = vector.load %arg5[%c1, %c0_12, %c0_13] : memref<5x2x128xf32, #tpu.memory_space<vmem>>, vector<1x2x128xf32>
    %14 = vector.shape_cast %13 : vector<1x2x128xf32> to vector<2x128xf32>
    %cst_14 = arith.constant dense<0.000000e+00> : vector<2x128xf32>
    %15 = vector.multi_reduction <add>, %3, %cst_14 [1] : vector<2x2x128xf32> to vector<2x128xf32>
    %16 = arith.addf %14, %15 : vector<2x128xf32>
    %c1_15 = arith.constant 1 : index
    %c0_16 = arith.constant 0 : index
    %c0_17 = arith.constant 0 : index
    %17 = vector.load %arg5[%c1_15, %c0_16, %c0_17] : memref<5x2x128xf32, #tpu.memory_space<vmem>>, vector<1x2x128xf32>
    %18 = vector.shape_cast %17 : vector<1x2x128xf32> to vector<2x128xf32>
    %19 = vector.shape_cast %16 : vector<2x128xf32> to vector<1x2x128xf32>
    tpu.vector_store %arg5[%c1_15, %c0_16, %c0_17], %19 {strides = array<i32>} : memref<5x2x128xf32, #tpu.memory_space<vmem>>, vector<1x2x128xf32>,
    %c2 = arith.constant 2 : index
    %c0_18 = arith.constant 0 : index
    %c0_19 = arith.constant 0 : index
    %20 = vector.load %arg5[%c2, %c0_18, %c0_19] : memref<5x2x128xf32, #tpu.memory_space<vmem>>, vector<1x2x128xf32>
    %21 = vector.shape_cast %20 : vector<1x2x128xf32> to vector<2x128xf32>
    %cst_20 = arith.constant dense<0.000000e+00> : vector<2x128xf32>
    %22 = vector.multi_reduction <add>, %4, %cst_20 [1] : vector<2x2x128xf32> to vector<2x128xf32>
    %23 = arith.addf %21, %22 : vector<2x128xf32>
    %c2_21 = arith.constant 2 : index
    %c0_22 = arith.constant 0 : index
    %c0_23 = arith.constant 0 : index
    %24 = vector.load %arg5[%c2_21, %c0_22, %c0_23] : memref<5x2x128xf32, #tpu.memory_space<vmem>>, vector<1x2x128xf32>
    %25 = vector.shape_cast %24 : vector<1x2x128xf32> to vector<2x128xf32>
    %26 = vector.shape_cast %23 : vector<2x128xf32> to vector<1x2x128xf32>
    tpu.vector_store %arg5[%c2_21, %c0_22, %c0_23], %26 {strides = array<i32>} : memref<5x2x128xf32, #tpu.memory_space<vmem>>, vector<1x2x128xf32>,
    %27 = math.log %3 : vector<2x2x128xf32>
    %cst_24 = arith.constant -1.000000e+02 : f32
    %28 = vector.broadcast %cst_24 : f32 to vector<2x2x128xf32>
    %29 = arith.maximumf %27, %28 : vector<2x2x128xf32>
    %cst_25 = arith.constant 1.000000e+00 : f32
    %30 = vector.broadcast %cst_25 : f32 to vector<2x2x128xf32>
    %31 = arith.subf %30, %3 : vector<2x2x128xf32>
    %32 = math.log %31 : vector<2x2x128xf32>
    %cst_26 = arith.constant -1.000000e+02 : f32
    %33 = vector.broadcast %cst_26 : f32 to vector<2x2x128xf32>
    %34 = arith.maximumf %32, %33 : vector<2x2x128xf32>
    %35 = arith.subf %29, %34 : vector<2x2x128xf32>
    %36 = arith.mulf %4, %35 : vector<2x2x128xf32>
    %37 = arith.addf %34, %36 : vector<2x2x128xf32>
    %c3 = arith.constant 3 : index
    %c0_27 = arith.constant 0 : index
    %c0_28 = arith.constant 0 : index
    %38 = vector.load %arg5[%c3, %c0_27, %c0_28] : memref<5x2x128xf32, #tpu.memory_space<vmem>>, vector<1x2x128xf32>
    %39 = vector.shape_cast %38 : vector<1x2x128xf32> to vector<2x128xf32>
    %cst_29 = arith.constant dense<0.000000e+00> : vector<2x128xf32>
    %40 = vector.multi_reduction <add>, %37, %cst_29 [1] : vector<2x2x128xf32> to vector<2x128xf32>
    %41 = arith.addf %39, %40 : vector<2x128xf32>
    %c3_30 = arith.constant 3 : index
    %c0_31 = arith.constant 0 : index
    %c0_32 = arith.constant 0 : index
    %42 = vector.load %arg5[%c3_30, %c0_31, %c0_32] : memref<5x2x128xf32, #tpu.memory_space<vmem>>, vector<1x2x128xf32>
    %43 = vector.shape_cast %42 : vector<1x2x128xf32> to vector<2x128xf32>
    %44 = vector.shape_cast %41 : vector<2x128xf32> to vector<1x2x128xf32>
    tpu.vector_store %arg5[%c3_30, %c0_31, %c0_32], %44 {strides = array<i32>} : memref<5x2x128xf32, #tpu.memory_space<vmem>>, vector<1x2x128xf32>,
    %c4 = arith.constant 4 : index
    %c0_33 = arith.constant 0 : index
    %c0_34 = arith.constant 0 : index
    %45 = vector.load %arg5[%c4, %c0_33, %c0_34] : memref<5x2x128xf32, #tpu.memory_space<vmem>>, vector<1x2x128xf32>
    %46 = vector.shape_cast %45 : vector<1x2x128xf32> to vector<2x128xf32>
    %47 = arith.mulf %4, %37 : vector<2x2x128xf32>
    %cst_35 = arith.constant dense<0.000000e+00> : vector<2x128xf32>
    %48 = vector.multi_reduction <add>, %47, %cst_35 [1] : vector<2x2x128xf32> to vector<2x128xf32>
    %49 = arith.addf %46, %48 : vector<2x128xf32>
    %c4_36 = arith.constant 4 : index
    %c0_37 = arith.constant 0 : index
    %c0_38 = arith.constant 0 : index
    %50 = vector.load %arg5[%c4_36, %c0_37, %c0_38] : memref<5x2x128xf32, #tpu.memory_space<vmem>>, vector<1x2x128xf32>
    %51 = vector.shape_cast %50 : vector<1x2x128xf32> to vector<2x128xf32>
    %52 = vector.shape_cast %49 : vector<2x128xf32> to vector<1x2x128xf32>
    tpu.vector_store %arg5[%c4_36, %c0_37, %c0_38], %52 {strides = array<i32>} : memref<5x2x128xf32, #tpu.memory_space<vmem>>, vector<1x2x128xf32>,
    %c0_i32_39 = arith.constant 0 : i32
    %53 = arith.cmpi eq, %arg1, %c0_i32_39 : i32
    %54 = arith.extui %53 : i1 to i32
    %c0_i32_40 = arith.constant 0 : i32
    %55 = arith.cmpi ne, %54, %c0_i32_40 : i32
    scf.if %55 {
      %c0_41 = arith.constant 0 : index
      %c0_42 = arith.constant 0 : index
      %c0_43 = arith.constant 0 : index
      %56 = vector.load %arg5[%c0_41, %c0_42, %c0_43] : memref<5x2x128xf32, #tpu.memory_space<vmem>>, vector<5x2x128xf32>
      %c0_44 = arith.constant 0 : index
      %c0_45 = arith.constant 0 : index
      %c0_46 = arith.constant 0 : index
      %c0_47 = arith.constant 0 : index
      %57 = vector.load %arg4[%c0_44, %c0_45, %c0_46, %c0_47] : memref<1x5x2x128xf32, #tpu.memory_space<vmem>>, vector<1x5x2x128xf32>
      %58 = vector.shape_cast %57 : vector<1x5x2x128xf32> to vector<5x2x128xf32>
      %59 = vector.shape_cast %56 : vector<5x2x128xf32> to vector<1x5x2x128xf32>
      tpu.vector_store %arg4[%c0_44, %c0_45, %c0_46, %c0_47], %59 {strides = array<i32>} : memref<1x5x2x128xf32, #tpu.memory_space<vmem>>, vector<1x5x2x128xf32>,
    } else {
    }
    return
  }
  func.func @transform_0(%arg0: i32, %arg1: i32) -> (i32, i32, i32) {
    %c1_i32 = arith.constant 1 : i32
    %0 = arith.muli %arg0, %c1_i32 : i32
    %1 = arith.addi %0, %arg1 : i32
    %c0_i32 = arith.constant 0 : i32
    %c0_i32_0 = arith.constant 0 : i32
    %c0_i32_1 = arith.constant 0 : i32
    return %c0_i32, %1, %c0_i32_0 : i32, i32, i32
  }
  func.func @transform_1(%arg0: i32, %arg1: i32) -> (i32, i32, i32) {
    %c1_i32 = arith.constant 1 : i32
    %0 = arith.muli %arg0, %c1_i32 : i32
    %1 = arith.addi %0, %arg1 : i32
    %c0_i32 = arith.constant 0 : i32
    %c0_i32_0 = arith.constant 0 : i32
    %c0_i32_1 = arith.constant 0 : i32
    return %c0_i32, %1, %c0_i32_0 : i32, i32, i32
  }
  func.func @transform_2(%arg0: i32, %arg1: i32) -> (i32, i32, i32, i32) {
    %c0_i32 = arith.constant 0 : i32
    %c0_i32_0 = arith.constant 0 : i32
    %c0_i32_1 = arith.constant 0 : i32
    %c0_i32_2 = arith.constant 0 : i32
    return %arg0, %c0_i32, %c0_i32_0, %c0_i32_1 : i32, i32, i32, i32
  }
}

</mosaic_0001>

<bundles_post_ra>
// kernel: all_loss.1
= control target key start
LH: loop header
LB: loop body
LE: loop exit
PB: predicated region body
PF: predicated region fallthrough
CT: control target
= control target key end

     0   :  { %vm61_vm0 = vcmask 1041408   ;;  %v231_v0 = vmov 0.0   ;;  %vm78_vm1 = vcmask 1041409   ;;  %s292_s0 = inlined_call_operand.vmem [shape: f32[2,2,128], index: 0, kind: input, shape index: {}]   ;;  %s293_s1 = inlined_call_operand.vmem [shape: f32[2,2,128], index: 1, kind: input, shape index: {}]   ;;  %s294_s2 = inlined_call_operand.vmem [shape: f32[1,5,2,128], index: 2, kind: output, shape index: {}]  }
   0x1   :  { %49 = vst [vmem:[#allocation2] sm:$0x3] %v231_v0  ;;  %50 = vst [vmem:[#allocation2 + $0x2] sm:$0x3] %v231_v0  ;;  %v54_v1 = vld [vmem:[%s292_s0] sm:$0x3] }
   0x2   :  { %51 = vst [vmem:[#allocation2 + $0x4] sm:$0x3] %v231_v0  ;;  %52 = vst [vmem:[#allocation2 + $0x6] sm:$0x3] %v231_v0  ;;  %v55_v2 = vld [vmem:[%s292_s0 + $0x2] sm:$0x3]  ;;  %223 = vlog2.f32 %v54_v1 }
   0x3   :  { %53 = vst [vmem:[#allocation2 + $0x8] sm:$0x3] %v231_v0  ;;  %v256_v3 = vld [vmem:[%s293_s1] sm:$0x3]  ;;  %v261_v4 = vld [vmem:[%s293_s1 + $0x2] sm:$0x3]  ;;  %225 = vlog2.f32 %v55_v2 }
   0x4   :  { %v59_v5 = vmul.f32 %v256_v3, %v54_v1  ;;  %v85_v6 = vsel %vm61_vm0, %v54_v1, 0.0  ;;  %v92_v7 = vsel %vm61_vm0, %v55_v2, 0.0  ;;  %v60_v8 = vmul.f32 %v261_v4, %v55_v2 }
   0x5   :  { %v86_v9 = vrot.slane %v85_v6, 4  ;;  %v93_v10 = vrot.slane %v92_v7, 4  ;;  %v107_v12 = vsel %vm61_vm0, %v256_v3, 0.0  ;;  %v114_v13 = vsel %vm61_vm0, %v261_v4, 0.0 }
   0x6   :  { %v62_v11 = vsel %vm61_vm0, %v59_v5, 0.0  ;;  %v133_v14 = vsub.f32 1.0, %v54_v1  ;;  %v69_v16 = vsel %vm61_vm0, %v60_v8, 0.0  ;;  %v108_v20 = vrot.slane %v107_v12, 4 }
   0x7   :  { %v63_v15 = vrot.slane %v62_v11, 4  ;;  %v87_v17 = vadd.f32 %v86_v9, %v85_v6  ;;  %v94_v18 = vadd.f32 %v93_v10, %v92_v7  ;;  %v70_v19 = vrot.slane %v69_v16, 4 }
   0x8   :  { %v115_v21 = vrot.slane %v114_v13, 4  ;;  %v134_v22 = vsub.f32 1.0, %v55_v2  ;;  %227 = vlog2.f32 %v133_v14  ;;  %v109_v27 = vadd.f32 %v108_v20, %v107_v12  ;;  %v84_v44 = vld [vmem:[#allocation2 + $0x2] sm:$0x3]  ;;  %v58_v54 = vld [vmem:[#allocation2] sm:$0x3] }
   0x9   :  { %v64_v23 = vadd.f32 %v63_v15, %v62_v11  ;;  %v88_v24 = vrot.slane %v87_v17, 2  ;;  %v95_v25 = vrot.slane %v94_v18, 2  ;;  %v71_v26 = vadd.f32 %v70_v19, %v69_v16  ;;  %v106_v57 = vld [vmem:[#allocation2 + $0x4] sm:$0x3] }
   0xa   :  { %v116_v28 = vadd.f32 %v115_v21, %v114_v13  ;;  %229 = vlog2.f32 %v134_v22  ;;  %v110_v33 = vrot.slane %v109_v27, 2 }
   0xb   :  { %v65_v29 = vrot.slane %v64_v23, 2  ;;  %v89_v30 = vadd.f32 %v88_v24, %v87_v17  ;;  %v96_v31 = vadd.f32 %v95_v25, %v94_v18  ;;  %v72_v32 = vrot.slane %v71_v26, 2 }
   0xc   :  { %v117_v34 = vrot.slane %v116_v28, 2  ;;  %v224_v38 = vpop.eup %223  ;;  %v111_v40 = vadd.f32 %v110_v33, %v109_v27 }
   0xd   :  { %v66_v35 = vadd.f32 %v65_v29, %v64_v23  ;;  %v90_v36 = vrot.slane %v89_v30, 1  ;;  %v97_v37 = vrot.slane %v96_v31, 1  ;;  %v73_v39 = vadd.f32 %v72_v32, %v71_v26  ;;  %v226_v42 = vpop.eup %225 }
   0xe   :  { %v118_v41 = vadd.f32 %v117_v34, %v116_v28  ;;  %v112_v48 = vrot.slane %v111_v40, 1  ;;  %v128_v50 = vmul.f32 0.6931472, %v224_v38  ;;  %v130_v53 = vmul.f32 0.6931472, %v226_v42 }
   0xf   :  { %v67_v43 = vrot.slane %v66_v35, 1  ;;  %v91_v45 = vadd.f32 %v90_v36, %v89_v30  ;;  %v98_v46 = vadd.f32 %v97_v37, %v96_v31  ;;  %v74_v47 = vrot.slane %v73_v39, 1 }
  0x10   :  { %v119_v49 = vrot.slane %v118_v41, 1  ;;  %v113_v58 = vadd.f32 %v112_v48, %v111_v40  ;;  %v131_v0 = vmax.f32 %v128_v50, -100.0  ;;  %v132_v6 = vmax.f32 %v130_v53, -100.0  ;;  %v148_v40 = vld [vmem:[#allocation2 + $0x6] sm:$0x3] }
  0x11   :  { %v68_v51 = vadd.f32 %v67_v43, %v66_v35  ;;  %v101_v52 = vsel %vm78_vm1, %v98_v46, %v91_v45  ;;  %v75_v55 = vadd.f32 %v74_v47, %v73_v39  ;;  %v170_v45 = vld [vmem:[#allocation2 + $0x8] sm:$0x3] }
  0x12   :  { %v103_v56 = vadd.f32 %v101_v52, %v84_v44  ;;  %v120_v59 = vadd.f32 %v119_v49, %v118_v41  ;;  %v228_v60 = vpop.eup %227 }
  0x13   :  { %v79_v62 = vsel %vm78_vm1, %v75_v55, %v68_v51  ;;  %v136_v1 = vmul.f32 0.6931472, %v228_v60 }
  0x14   :  { %v230_v61 = vpop.eup %229  ;;  %104 = vst [vmem:[#allocation2 + $0x2] sm:$0x3] %v103_v56  ;;  %v123_v63 = vsel %vm78_vm1, %v120_v59, %v113_v58  ;;  %v81_v2 = vadd.f32 %v79_v62, %v58_v54 }
  0x15   :  { %v125_v5 = vadd.f32 %v123_v63, %v106_v57  ;;  %v138_v7 = vmul.f32 0.6931472, %v230_v61  ;;  %v139_v8 = vmax.f32 %v136_v1, -100.0 }
  0x16   :  { %82 = vst [vmem:[#allocation2] sm:$0x3] %v81_v2 }
  0x17   :  { %126 = vst [vmem:[#allocation2 + $0x4] sm:$0x3] %v125_v5  ;;  %v140_v9 = vmax.f32 %v138_v7, -100.0  ;;  %v141_v10 = vsub.f32 %v131_v0, %v139_v8 }
  0x19   :  { %v142_v11 = vsub.f32 %v132_v6, %v140_v9  ;;  %v143_v12 = vmul.f32 %v141_v10, %v256_v3 }
  0x1b   :  { %v144_v13 = vmul.f32 %v142_v11, %v261_v4  ;;  %v145_v14 = vadd.f32 %v143_v12, %v139_v8 }
  0x1d   :  { %v146_v15 = vadd.f32 %v144_v13, %v140_v9  ;;  %v149_v16 = vsel %vm61_vm0, %v145_v14, 0.0  ;;  %v171_v17 = vmul.f32 %v145_v14, %v256_v3 }
  0x1e   :  { %v150_v18 = vrot.slane %v149_v16, 4 }
  0x1f   :  { %v156_v19 = vsel %vm61_vm0, %v146_v15, 0.0  ;;  %v172_v20 = vmul.f32 %v146_v15, %v261_v4  ;;  %v173_v22 = vsel %vm61_vm0, %v171_v17, 0.0 }
  0x20   :  { %v157_v21 = vrot.slane %v156_v19, 4  ;;  %v151_v23 = vadd.f32 %v150_v18, %v149_v16  ;;  %v174_v24 = vrot.slane %v173_v22, 4 }
  0x21   :  { %v180_v25 = vsel %vm61_vm0, %v172_v20, 0.0 }
  0x22   :  { %v158_v26 = vadd.f32 %v157_v21, %v156_v19  ;;  %v181_v27 = vrot.slane %v180_v25, 4  ;;  %v152_v28 = vrot.slane %v151_v23, 2  ;;  %v175_v29 = vadd.f32 %v174_v24, %v173_v22 }
  0x24   :  { %v159_v30 = vrot.slane %v158_v26, 2  ;;  %v182_v31 = vadd.f32 %v181_v27, %v180_v25  ;;  %v153_v32 = vadd.f32 %v152_v28, %v151_v23  ;;  %v176_v3 = vrot.slane %v175_v29, 2 }
  0x26   :  { %v160_v33 = vadd.f32 %v159_v30, %v158_v26  ;;  %v183_v34 = vrot.slane %v182_v31, 2  ;;  %v154_v35 = vrot.slane %v153_v32, 1  ;;  %v177_v36 = vadd.f32 %v176_v3, %v175_v29 }
  0x28   :  { %v161_v4 = vrot.slane %v160_v33, 1  ;;  %v184_v37 = vadd.f32 %v183_v34, %v182_v31  ;;  %v155_v38 = vadd.f32 %v154_v35, %v153_v32  ;;  %v178_v39 = vrot.slane %v177_v36, 1 }
  0x2a   :  { %v162_v41 = vadd.f32 %v161_v4, %v160_v33  ;;  %v185_v42 = vrot.slane %v184_v37, 1  ;;  %v179_v43 = vadd.f32 %v178_v39, %v177_v36 }
  0x2c   :  { %v165_v44 = vsel %vm78_vm1, %v162_v41, %v155_v38  ;;  %v186_v46 = vadd.f32 %v185_v42, %v184_v37 }
  0x2d   :  { %v167_v47 = vadd.f32 %v165_v44, %v148_v40 }
  0x2e   :  { %v189_v48 = vsel %vm78_vm1, %v186_v46, %v179_v43 }
  0x2f   :  { %168 = vst [vmem:[#allocation2 + $0x6] sm:$0x3] %v167_v47  ;;  %v191_v49 = vadd.f32 %v189_v48, %v170_v45 }
  0x31   :  { %192 = vst [vmem:[#allocation2 + $0x8] sm:$0x3] %v191_v49 }
  0x36   :  { %v196_v50 = vld [vmem:[#allocation2] sm:$0xff]  }
  0x37   :  { %201 = vst [vmem:[%s294_s2] sm:$0xff] %v196_v50  }
  0x38   :  { %v200_v51 = vld [vmem:[#allocation2 + $0x8] sm:$0x3] }
  0x39   :  { %205 = vst [vmem:[%s294_s2 + $0x8] sm:$0x3] %v200_v51 }

</bundles_post_ra>
